<compile_context>
chip_gen: v7x
topology: tpu7x:2x2x1
jax: 0.10.0
libtpu: 0.0.40
codegen_flags: <defaults>
</compile_context>

<pallas_src>
import jax
import jax.numpy as jnp
from jax.experimental import pallas as pl
from jax.experimental.pallas import tpu as pltpu


def _linear_kernel(x_ref, w_ref, b_ref, o_ref):
    # (TM, K) @ (K, r) on the MXU, f32 accumulation; bias is an SMEM scalar.
    acc = jnp.dot(x_ref[...], w_ref[...], preferred_element_type=jnp.float32)
    o_ref[...] = (acc + b_ref[0]).astype(o_ref.dtype)


def linear_regression_forward(x, weight, bias, *,
                              tile_bytes=4 * 1024 * 1024,
                              min_grid_steps=2,
                              use_bf16=False):
    """Pallas equivalent of torch.nn.Linear(in_features, 1).forward.

    Args:
      x:      (batch, in_features) float32
      weight: (1, in_features)     float32  -- PyTorch convention
      bias:   (1,)                 float32
      tile_bytes:     target size of one x row-tile in VMEM (double-buffered by
                      the BlockSpec pipeline, so keep <= ~4-8 MiB).
      min_grid_steps: minimum number of grid steps when rows allow it (>=2 so
                      v7x megacore has work for both TensorCores).
      use_bf16:       stream x / weight as bf16 (halves HBM bytes; storage
                      rounding only, accumulation stays f32).
    Returns:
      (batch, 1) float32
    """
    x = x.astype(jnp.float32)
    batch, in_features = x.shape
    w_vec = weight.reshape(in_features).astype(jnp.float32)
    b1 = bias.reshape(1).astype(jnp.float32)

    # ---- Lane packing: r logical rows per 128-lane physical row (K <= 128 when
    # in_features < 128; for in_features >= 128, r = 1 and K = in_features). ----
    r = max(1, 128 // in_features)
    K = r * in_features

    main_batch = (batch // r) * r
    rows = main_batch // r

    # <= r-1 leftover rows: trivial jnp matvec instead of padding/copying x.
    tail_out = None
    if main_batch < batch:
        tail_out = x[main_batch:] @ w_vec[:, None] + b1[None, :]

    if rows == 0:
        return tail_out

    # Free contiguous (row-major) view: (main_batch, in) -> (rows, K).  No pads.
    x_packed = x[:main_batch].reshape(rows, K)

    # ---- Row-tile size: multi-MiB tiles for the HBM-bound stream. ----
    in_itemsize = 2 if use_bf16 else 4
    tm_cap = max(8, (tile_bytes // (K * in_itemsize)) // 8 * 8)
    if rows >= 8 * min_grid_steps:
        steps = max(min_grid_steps, pl.cdiv(rows, tm_cap))
    else:
        steps = 1
    tm = min(tm_cap, max(8, pl.cdiv(pl.cdiv(rows, steps), 8) * 8))
    # Ragged last block: OOB reads see garbage, but their writebacks are dropped
    # by Pallas, so no jnp.pad of x is needed.
    grid = (pl.cdiv(rows, tm),)

    # Block-diagonal weight (K, r): column j holds w in rows [j*in : (j+1)*in).
    w_block = (jnp.eye(r, dtype=jnp.float32)[:, None, :]
               * w_vec[None, :, None]).reshape(K, r)

    if use_bf16:
        x_packed = x_packed.astype(jnp.bfloat16)
        w_block = w_block.astype(jnp.bfloat16)

    out_packed = pl.pallas_call(
        _linear_kernel,
        out_shape=jax.ShapeDtypeStruct((rows, r), jnp.float32),
        grid=grid,
        in_specs=[
            pl.BlockSpec((tm, K), lambda i: (i, 0)),            # x: row-tiled, pipelined
            pl.BlockSpec((K, r), lambda i: (0, 0)),             # weight: VMEM-resident
            pl.BlockSpec(memory_space=pltpu.MemorySpace.SMEM),  # bias: SMEM scalar
        ],
        out_specs=pl.BlockSpec((tm, r), lambda i: (i, 0)),
        compiler_params=pltpu.CompilerParams(
            dimension_semantics=("parallel",),
        ),
        cost_estimate=pl.CostEstimate(
            flops=2 * main_batch * in_features,
            bytes_accessed=in_itemsize * (main_batch * in_features + K * r)
                           + 4 * main_batch,
            transcendentals=0,
        ),
    )(x_packed, w_block, b1)

    # Unpack lanes back to (main_batch, 1); append tail rows if any.
    out_main = out_packed.reshape(main_batch, 1)
    if tail_out is None:
        return out_main
    return jnp.concatenate([out_main, tail_out], axis=0)


if __name__ == "__main__":
    key = jax.random.PRNGKey(0)

    def run_case(batch, in_features):
        kx, kw, kb = jax.random.split(jax.random.fold_in(key, in_features), 3)
        # Deterministic params mimicking nn.Linear's U(-1/sqrt(in), 1/sqrt(in)).
        bound = 1.0 / (in_features ** 0.5)
        weight = jax.random.uniform(kw, (1, in_features), jnp.float32, -bound, bound)
        bias = jax.random.uniform(kb, (1,), jnp.float32, -bound, bound)
        x = jax.random.normal(kx, (batch, in_features), jnp.float32)

        out = jax.block_until_ready(linear_regression_forward(x, weight, bias))

        ref = x @ weight.T + bias
        assert out.shape == (batch, 1)
        assert jnp.allclose(out, ref, atol=1e-4, rtol=1e-4), (
            float(jnp.max(jnp.abs(out - ref))))

    # Case 1: in_features=32 -> lane-pack r=4, K=128, rows=512, 2 pipelined tiles.
    run_case(batch=2048, in_features=32)
    # Case 2: in_features=48 (not a divisor of 128) -> r=2, K=96; batch % r = 1
    # tail row and a ragged final grid block (exercises the no-pad path).
    run_case(batch=515, in_features=48)

    print("KERNEL_OK")
</pallas_src>

<mosaic_0001>
module attributes {stable_mosaic.version = 11 : i64} {
  func.func @_linear_kernel(%arg0: i32, %arg1: memref<256x128xf32, #tpu.memory_space<vmem>>, %arg2: memref<128x4xf32, #tpu.memory_space<vmem>>, %arg3: memref<1xf32, #tpu.memory_space<smem>>, %arg4: memref<256x4xf32, #tpu.memory_space<vmem>>) attributes {dimension_semantics = [#tpu.dimension_semantics<parallel>], iteration_bounds = array<i64: 2>, scalar_prefetch = 0 : i64, scratch_operands = 0 : i64, tpu.core_type = #tpu.core_type<tc>, window_params = [{transform_indices = @transform_0, window_bounds = array<i64: 256, 128>}, {pipeline_mode = #tpu.pipeline_mode<synchronous>, transform_indices = @transform_1, window_bounds = array<i64: 128, 4>}, {transform_indices = @transform_2, window_bounds = array<i64: 1>}, {transform_indices = @transform_3, window_bounds = array<i64: 256, 4>}]} {
    %c0 = arith.constant 0 : index
    %c0_0 = arith.constant 0 : index
    %0 = vector.load %arg1[%c0, %c0_0] : memref<256x128xf32, #tpu.memory_space<vmem>>, vector<256x128xf32>
    %c0_1 = arith.constant 0 : index
    %c0_2 = arith.constant 0 : index
    %1 = vector.load %arg2[%c0_1, %c0_2] : memref<128x4xf32, #tpu.memory_space<vmem>>, vector<128x4xf32>
    %cst = arith.constant dense<0.000000e+00> : vector<256x4xf32>
    %2 = tpu.matmul %0, %1, %cst {dimension_numbers = #tpu.dot_dimension_numbers<[1], [0], [0], [1], [0, 0, 1, 1], [], []>} : vector<256x128xf32>, vector<128x4xf32>, vector<256x4xf32> -> vector<256x4xf32>
    %c0_3 = arith.constant 0 : index
    %3 = memref.load %arg3[%c0_3] : memref<1xf32, #tpu.memory_space<smem>>
    %4 = vector.broadcast %3 : f32 to vector<256x4xf32>
    %5 = arith.addf %2, %4 : vector<256x4xf32>
    %c0_4 = arith.constant 0 : index
    %c0_5 = arith.constant 0 : index
    %6 = vector.load %arg4[%c0_4, %c0_5] : memref<256x4xf32, #tpu.memory_space<vmem>>, vector<256x4xf32>
    tpu.vector_store %arg4[%c0_4, %c0_5], %5 {strides = array<i32>} : memref<256x4xf32, #tpu.memory_space<vmem>>, vector<256x4xf32>,
    return
  }
  func.func @transform_0(%arg0: i32) -> (i32, i32) {
    %c0_i32 = arith.constant 0 : i32
    %c0_i32_0 = arith.constant 0 : i32
    return %arg0, %c0_i32 : i32, i32
  }
  func.func @transform_1(%arg0: i32) -> (i32, i32) {
    %c0_i32 = arith.constant 0 : i32
    %c0_i32_0 = arith.constant 0 : i32
    %c0_i32_1 = arith.constant 0 : i32
    return %c0_i32, %c0_i32_0 : i32, i32
  }
  func.func @transform_2(%arg0: i32) -> i32 {
    %c0_i32 = arith.constant 0 : i32
    %c0_i32_0 = arith.constant 0 : i32
    return %c0_i32 : i32
  }
  func.func @transform_3(%arg0: i32) -> (i32, i32) {
    %c0_i32 = arith.constant 0 : i32
    %c0_i32_0 = arith.constant 0 : i32
    return %arg0, %c0_i32 : i32, i32
  }
}

</mosaic_0001>

<bundles_post_ra>
// kernel: tpu_custom_call.1
= control target key start
LH: loop header
LB: loop body
LE: loop exit
PB: predicated region body
PF: predicated region fallthrough
CT: control target
= control target key end

     0   :  { %s1181_s0 = inlined_call_operand.hbm [shape: f32[512,128], index: 0, kind: input, shape index: {}]   ;;  %s1182_s1 = inlined_call_operand.vmem [shape: f32[128,4], index: 1, kind: input, shape index: {}]   ;;  %s1183_s2 = inlined_call_operand.<no memory space> [shape: f32[1], index: 2, kind: input, shape index: {}]   ;;  %s1184_s3 = inlined_call_operand.vmem [shape: f32[512,4], index: 3, kind: output, shape index: {}]  }
   0x1   :  { %8 = sst [smem:[#allocation2]] %s1183_s2 }
   0x2   :  { %9 = vsyncpa [#allocation4], 0 }
   0x3   :  { %11 = vsyncpa [#allocation4 + $0x1], 0  ;;  %s892_s14 = smov 0   ;;  %s894_s15 = smov 0  }
   0x4   :  { %s896_s16 = smov 0   ;;  %s898_s17 = smov 0  }
   0x5 LB: > { %s569_s2 = sadd.s32 4294967295, %s864_s17   ;;  %s912_s18 = sadd.s32 1, %s864_s17   ;;  %s864_s17 = sphi %s898_s17, %s1191_s17   ;;  %s860_s16 = sphi %s896_s16, %s1190_s16   ;;  %s856_s15 = sphi %s894_s15, %s1189_s15   ;;  %s852_s14 = sphi %s892_s14, %s1188_s14  }
   0x6   : > { %s21_s19 = ssub.s32 %s864_s17, %s912_s18  ;;  %s24_s20 = sadd.s32 1, %s860_s16 }
   0x7   : > { %p22_p0 = scmp.eq.s32.totalorder %s21_s19, 0  ;;  %p31_p1 = scmp.ne.s32.totalorder %s860_s16, %s856_s15 }
   0x8   : > { %p32_p2 = scmp.eq.s32.totalorder %s864_s17, 0  ;;  %p37_p3 = scmp.ne.s32.totalorder %s856_s15, %s852_s14 }
   0x9   : > { %s922_s21 = scalar_select %p22_p0, %s860_s16, %s24_s20  }
   0xa   : > { %p33_p4 = por %p32_p2, %p31_p1  ;;  %p38_p5 = scmp.eq.s32.totalorder %s569_s2, 0 }
   0xb   : > { %p765_p6 = scmp.lt.s32.totalorder %s864_s17, 2  ;;  %s135_s23 = sand.u32 1, %s860_s16  }
   0xc   : > { %p927_p7 = por %p38_p5, %p37_p3  ;;  %s573_s24 = sshll.u32 %s135_s23, 8 }
   0xd   : > { %s582_s25 = sshll.u32 %s864_s17, 12  ;;  %s139_s29 = scalar_lea.vmem [#allocation3], %s573_s24 }
   0xe   : > { %s936_s28 = scalar_lea.hbm %s1181_s0, %s582_s25  ;;  %s146_s30 = sshll.u32 %s139_s29, 4  ;;  %s938_s30 = int_to_ptr.vmem [resolvable:$true] %s146_s30 }
   0xf   : > { %p940_p8 = pnand %p765_p6, %p33_p4  ;;  %s945_s5 = scalar_lea.sflag [#allocation4], %s135_s23 }
  0x10   : > { %s800_s6 = scalar_lea.hbm %s936_s28, 4096  ;;  %s805_s9 = scalar_lea.hbm %s1181_s0, 8192 }
  0x11   : > { %p801_p10 = scmp.ne.s32.totalorder %s936_s28, %s800_s6  ;;  %p802_p11 = pneg %p940_p8 }
  0x12   : > { %p806_p0 = scmp.lt.u32.totalorder %s936_s28, %s1181_s0  ;;  %p807_p1 = scmp.lt.u32.totalorder %s805_s9, %s800_s6 }
  0x13   : > { %p803_p12 = pnand %p802_p11, %p801_p10  ;;  %p809_p3 = scmp.lt.u32.totalorder %s800_s6, %s936_s28 }
  0x14   : > { %p808_p2 = por %p807_p1, %p806_p0 }
  0x15   : > { %p804_p13 = pneg %p803_p12 }
  0x16   : > { %p810_p4 = por %p809_p3, %p808_p2 }
  0x18   : > { %p811_p5 = pnand %p810_p4, %p804_p13 }
  0x1a   : > { %814 = shalt.err (!%p811_p5)
}
  0x1b   : > { %s815_s12 = scalar_lea.vmem %s938_s30, 4096  ;;  %s866_s13 = smov [#allocation3]  }
  0x1c   : > { %p816_p6 = scmp.ne.s32.totalorder %s938_s30, %s815_s12  ;;  %s820_s14 = sshll.u32 %s866_s13, 4  ;;  %s821_s14 = int_to_ptr.vmem [resolvable:$false] %s820_s14 }
  0x1d   : > { %s822_s19 = scalar_lea.vmem %s821_s14, 8192  ;;  %p823_p9 = scmp.lt.s32.totalorder %s938_s30, %s821_s14 }
  0x1e   : > { %p818_p10 = pnand %p816_p6, %p802_p11  ;;  %p824_p0 = scmp.lt.s32.totalorder %s822_s19, %s815_s12 }
  0x20   : > { %p819_p12 = pneg %p818_p10  ;;  %p825_p1 = por %p824_p0, %p823_p9 }
  0x22   : > { %p826_p2 = pnand %p825_p1, %p819_p12 }
  0x24   : > { %829 = shalt.err (!%p826_p2)
}
  0x25   : > { %s867_s20 = smov 128   ;;  %s868_s23 = smov 8  }
  0x26   : > { %764 = dma.hbm_to_vmem [thread:$0]  (!%p940_p8), %s936_s28, 4096, %s938_s30, %s945_s5, %s867_s20, %s867_s20, %s868_s23  }
  0x27   : > { %p154_p11 = scmp.lt.s32.totalorder %s864_s17, 3  ;;  %p1187_p13 = scmp.ge.s32.totalorder %s864_s17, 1 }
  0x29   : > { %p155_p3 = pnand %p1187_p13, %p154_p11 }
  0x2a   : > { %s160_s24 = sand.u32 (!%p155_p3), 1, %s856_s15  }
  0x2b   : > { %158 = sbr.rel (%p155_p3) target bundleno = 330 (0x14a), region = 32  ;;  %s577_s25 = sshll.u32 (!%p155_p3), %s160_s24, 8 }
  0x2c   : > { %s161_s26 = scalar_lea.sflag (!%p155_p3), [#allocation4], %s160_s24  ;;  %s977_s27 = scalar_lea.vmem (!%p155_p3), [#allocation3], %s577_s25 }
  0x32   : > { %847 = dma.done.wait (%p927_p7), %s161_s26, 4096  }
  0x33   : > { %849 = vsyncadd (%p927_p7), %s161_s26, 4294963200  ;;  %v226_v0 = vld [vmem:[%s1182_s1] sm:$0xff]  ;;  %v227_v1 = vld [vmem:[%s1182_s1 + $0x8] sm:$0xff]  ;;  %s578_s11 = sshll.u32 %s569_s2, 5  ;;  %s242_s12 = sld [smem:[#allocation2]]  ;;  %vm469_vm0 = vcmask 31744  }
  0x34   : > { %v228_v2 = vld [vmem:[%s1182_s1 + $0x10] sm:$0xff]  ;;  %v711_v3 = vpack.c.bf16 %v227_v1, %v226_v0  ;;  %v229_v4 = vld [vmem:[%s1182_s1 + $0x18] sm:$0xff]  ;;  %v230_v6 = vld [vmem:[%s1182_s1 + $0x20] sm:$0xff]  ;;  %p189_p7 = scmp.lt.s32.totalorder %s578_s11, 63 }
  0x35   : > { %v715_v5 = vpack.c.bf16 %v229_v4, %v228_v2  ;;  %v231_v7 = vld [vmem:[%s1182_s1 + $0x28] sm:$0xff]  ;;  %v194_v9 = vld [vmem:[%s977_s27] sm:$0xff]  ;;  %v232_v11 = vld [vmem:[%s1182_s1 + $0x30] sm:$0xff] }
  0x36   : > { %712 = vmatprep.subr.bf16.mxu0 %v711_v3  ;;  %743 = vmatprep.subr.bf16.mxu1 %v711_v3  ;;  %v719_v8 = vpack.c.bf16 %v231_v7, %v230_v6  ;;  %v210_v10 = vld [vmem:[%s977_s27 + $0x80] sm:$0xff]  ;;  %v233_v12 = vld [vmem:[%s1182_s1 + $0x38] sm:$0xff]  ;;  %v235_v15 = vld [vmem:[%s1182_s1 + $0x48] sm:$0xff]  ;;  %s1193_s11 = smov (!%p189_p7, %s578_s11), 63 }
  0x37   : > { %714 = vmatpush3.bf16.msra.mxu0 %v711_v3  ;;  %751 = vmatpush3.bf16.msra.mxu1 %v711_v3  ;;  %v723_v13 = vpack.c.bf16 %v233_v12, %v232_v11  ;;  %v234_v14 = vld [vmem:[%s1182_s1 + $0x40] sm:$0xff]  ;;  %v236_v17 = vld [vmem:[%s1182_s1 + $0x50] sm:$0xff]  ;;  %v237_v18 = vld [vmem:[%s1182_s1 + $0x58] sm:$0xff]  ;;  %s579_s13 = sshll.u32 %s1193_s11, 3 }
  0x38   : > { %716 = vmatprep.subr.bf16.mxu0 %v715_v5  ;;  %744 = vmatprep.subr.bf16.mxu1 %v715_v5  ;;  %v727_v16 = vpack.c.bf16 %v235_v15, %v234_v14  ;;  %v731_v19 = vpack.c.bf16 %v237_v18, %v236_v17  ;;  %v238_v20 = vld [vmem:[%s1182_s1 + $0x60] sm:$0xff]  ;;  %v239_v21 = vld [vmem:[%s1182_s1 + $0x68] sm:$0xff]  ;;  %v240_v23 = vld [vmem:[%s1182_s1 + $0x70] sm:$0xff]  ;;  %s1070_s20 = scalar_lea.vmem %s1184_s3, %s579_s13 }
  0x39   : > { %663 = vmatprep.mubr.f32.mxu0 %v194_v9  ;;  %687 = vmatprep.mubr.f32.mxu1 %v210_v10  ;;  %v735_v22 = vpack.c.bf16 %v239_v21, %v238_v20  ;;  %v241_v24 = vld [vmem:[%s1182_s1 + $0x78] sm:$0xff]  ;;  %v195_v26 = vld [vmem:[%s977_s27 + $0x8] sm:$0xff]  ;;  %v196_v28 = vld [vmem:[%s977_s27 + $0x10] sm:$0xff]  ;;  %v1065_v56 = vstv %s242_s12 }
  0x3a   : > { %v739_v25 = vpack.c.bf16 %v241_v24, %v240_v23  ;;  %v211_v27 = vld [vmem:[%s977_s27 + $0x88] sm:$0xff]  ;;  %v212_v29 = vld [vmem:[%s977_s27 + $0x90] sm:$0xff]  ;;  %v197_v30 = vld [vmem:[%s977_s27 + $0x18] sm:$0xff] }
  0x3b   : > { %718 = vmatpush3.bf16.msra.mxu0 %v715_v5  ;;  %752 = vmatpush3.bf16.msra.mxu1 %v715_v5  ;;  %v213_v31 = vld [vmem:[%s977_s27 + $0x98] sm:$0xff]  ;;  %v198_v32 = vld [vmem:[%s977_s27 + $0x20] sm:$0xff]  ;;  %v199_v34 = vld [vmem:[%s977_s27 + $0x28] sm:$0xff] }
  0x3c   : > { %720 = vmatprep.subr.bf16.mxu0 %v719_v8  ;;  %745 = vmatprep.subr.bf16.mxu1 %v719_v8  ;;  %v214_v33 = vld [vmem:[%s977_s27 + $0xa0] sm:$0xff]  ;;  %v215_v35 = vld [vmem:[%s977_s27 + $0xa8] sm:$0xff]  ;;  %v200_v36 = vld [vmem:[%s977_s27 + $0x30] sm:$0xff] }
  0x3d   : > { %v216_v37 = vld [vmem:[%s977_s27 + $0xb0] sm:$0xff]  ;;  %v201_v38 = vld [vmem:[%s977_s27 + $0x38] sm:$0xff]  ;;  %v202_v40 = vld [vmem:[%s977_s27 + $0x40] sm:$0xff] }
  0x3e   : > { %v217_v39 = vld [vmem:[%s977_s27 + $0xb8] sm:$0xff]  ;;  %v218_v41 = vld [vmem:[%s977_s27 + $0xc0] sm:$0xff]  ;;  %v203_v42 = vld [vmem:[%s977_s27 + $0x48] sm:$0xff] }
  0x3f   : > { %722 = vmatpush3.bf16.msra.mxu0 %v719_v8  ;;  %753 = vmatpush3.bf16.msra.mxu1 %v719_v8  ;;  %v219_v43 = vld [vmem:[%s977_s27 + $0xc8] sm:$0xff]  ;;  %v204_v44 = vld [vmem:[%s977_s27 + $0x50] sm:$0xff]  ;;  %v205_v46 = vld [vmem:[%s977_s27 + $0x58] sm:$0xff] }
  0x40   : > { %724 = vmatprep.subr.bf16.mxu0 %v723_v13  ;;  %746 = vmatprep.subr.bf16.mxu1 %v723_v13  ;;  %v220_v45 = vld [vmem:[%s977_s27 + $0xd0] sm:$0xff]  ;;  %v221_v47 = vld [vmem:[%s977_s27 + $0xd8] sm:$0xff]  ;;  %v206_v48 = vld [vmem:[%s977_s27 + $0x60] sm:$0xff] }
  0x41   : > { %v222_v49 = vld [vmem:[%s977_s27 + $0xe0] sm:$0xff]  ;;  %v207_v50 = vld [vmem:[%s977_s27 + $0x68] sm:$0xff]  ;;  %v208_v52 = vld [vmem:[%s977_s27 + $0x70] sm:$0xff] }
  0x42   : > { %v223_v51 = vld [vmem:[%s977_s27 + $0xe8] sm:$0xff]  ;;  %v224_v53 = vld [vmem:[%s977_s27 + $0xf0] sm:$0xff]  ;;  %v209_v54 = vld [vmem:[%s977_s27 + $0x78] sm:$0xff] }
  0x43   : > { %726 = vmatpush3.bf16.msra.mxu0 %v723_v13  ;;  %754 = vmatpush3.bf16.msra.mxu1 %v723_v13  ;;  %v225_v55 = vld [vmem:[%s977_s27 + $0xf8] sm:$0xff] }
  0x44   : > { %728 = vmatprep.subr.bf16.mxu0 %v727_v16  ;;  %747 = vmatprep.subr.bf16.mxu1 %v727_v16 }
  0x47   : > { %730 = vmatpush3.bf16.msra.mxu0 %v727_v16  ;;  %755 = vmatpush3.bf16.msra.mxu1 %v727_v16 }
  0x48   : > { %732 = vmatprep.subr.bf16.mxu0 %v731_v19  ;;  %748 = vmatprep.subr.bf16.mxu1 %v731_v19 }
  0x4b   : > { %734 = vmatpush3.bf16.msra.mxu0 %v731_v19  ;;  %756 = vmatpush3.bf16.msra.mxu1 %v731_v19 }
  0x4c   : > { %736 = vmatprep.subr.bf16.mxu0 %v735_v22  ;;  %749 = vmatprep.subr.bf16.mxu1 %v735_v22 }
  0x4f   : > { %738 = vmatpush3.bf16.msra.mxu0 %v735_v22  ;;  %757 = vmatpush3.bf16.msra.mxu1 %v735_v22 }
  0x50   : > { %740 = vmatprep.subr.bf16.mxu0 %v739_v25  ;;  %750 = vmatprep.subr.bf16.mxu1 %v739_v25 }
  0x53   : > { %742 = vmatpush3.bf16.msra.mxu0 %v739_v25  ;;  %758 = vmatpush3.bf16.msra.mxu1 %v739_v25 }
  0x56   : > { %664 = vmatmul.mubr.f32.vlgmr.msra.gmra.mrb[0].mxu0 %v195_v26  ;;  %688 = vmatmul.mubr.f32.vlgmr.msra.gmra.mrb[0].mxu1 %v211_v27 }
  0x57   : > { %666 = vmatprep.mubr.f32.mxu0 %v196_v28  ;;  %690 = vmatprep.mubr.f32.mxu1 %v212_v29 }
  0x5a   : > { %667 = vmatmul.mubr.f32.gmra.mrb[2].mxu0 %v197_v30  ;;  %691 = vmatmul.mubr.f32.gmra.mrb[2].mxu1 %v213_v31 }
  0x5b   : > { %669 = vmatprep.mubr.f32.mxu0 %v198_v32  ;;  %693 = vmatprep.mubr.f32.mxu1 %v214_v33 }
  0x5e   : > { %670 = vmatmul.mubr.f32.gmra.mrb[4].mxu0 %v199_v34  ;;  %694 = vmatmul.mubr.f32.gmra.mrb[4].mxu1 %v215_v35 }
  0x5f   : > { %672 = vmatprep.mubr.f32.mxu0 %v200_v36  ;;  %696 = vmatprep.mubr.f32.mxu1 %v216_v37 }
  0x62   : > { %673 = vmatmul.mubr.f32.gmra.mrb[6].mxu0 %v201_v38  ;;  %697 = vmatmul.mubr.f32.gmra.mrb[6].mxu1 %v217_v39 }
  0x63   : > { %675 = vmatprep.mubr.f32.mxu0 %v202_v40  ;;  %699 = vmatprep.mubr.f32.mxu1 %v218_v41 }
  0x66   : > { %676 = vmatmul.mubr.f32.gmra.mrb[8].mxu0 %v203_v42  ;;  %700 = vmatmul.mubr.f32.gmra.mrb[8].mxu1 %v219_v43 }
  0x67   : > { %678 = vmatprep.mubr.f32.mxu0 %v204_v44  ;;  %702 = vmatprep.mubr.f32.mxu1 %v220_v45 }
  0x6a   : > { %679 = vmatmul.mubr.f32.gmra.mrb[10].mxu0 %v205_v46  ;;  %703 = vmatmul.mubr.f32.gmra.mrb[10].mxu1 %v221_v47 }
  0x6b   : > { %681 = vmatprep.mubr.f32.mxu0 %v206_v48  ;;  %705 = vmatprep.mubr.f32.mxu1 %v222_v49 }
  0x6e   : > { %682 = vmatmul.mubr.f32.gmra.mrb[12].mxu0 %v207_v50  ;;  %706 = vmatmul.mubr.f32.gmra.mrb[12].mxu1 %v223_v51 }
  0x6f   : > { %684 = vmatprep.mubr.f32.mxu0 %v208_v52  ;;  %708 = vmatprep.mubr.f32.mxu1 %v224_v53 }
  0x72   : > { %685 = vmatmul.mubr.f32.gmra.mrb[14].mxu0 %v209_v54  ;;  %709 = vmatmul.mubr.f32.gmra.mrb[14].mxu1 %v225_v55 }
 0x129   : > { %v665_v57 = vpop.f32.mrb[0].mxu0  ;;  %v689_v58 = vpop.f32.mrb[0].mxu1 }
 0x12a   : > { %v316_v59 = vadd.f32 %v665_v57, %v1065_v56  ;;  %v396_v60 = vadd.f32 %v689_v58, %v1065_v56  ;;  %v310_v61 = vpop.f32.mrb[1].mxu0  ;;  %v390_v62 = vpop.f32.mrb[1].mxu1 }
 0x12b   : > { %v311_v63 = vadd.f32 %v310_v61, %v1065_v56  ;;  %v391_v0 = vadd.f32 %v390_v62, %v1065_v56 }
 0x12c   : > { %471 = vst.msk [vmem:[%s1070_s20 + $0x8] sm:$0xff] %vm469_vm0, %v316_v59  ;;  %487 = vst.msk [vmem:[%s1070_s20 + $0x88] sm:$0xff] %vm469_vm0, %v396_v60 }
 0x12d   : > { %470 = vst.msk [vmem:[%s1070_s20] sm:$0xff] %vm469_vm0, %v311_v63  ;;  %486 = vst.msk [vmem:[%s1070_s20 + $0x80] sm:$0xff] %vm469_vm0, %v391_v0  ;;  %v668_v1 = vpop.f32.mrb[2].mxu0  ;;  %v692_v2 = vpop.f32.mrb[2].mxu1 }
 0x12e   : > { %v326_v3 = vadd.f32 %v668_v1, %v1065_v56  ;;  %v406_v4 = vadd.f32 %v692_v2, %v1065_v56  ;;  %v320_v5 = vpop.f32.mrb[3].mxu0  ;;  %v400_v6 = vpop.f32.mrb[3].mxu1 }
 0x12f   : > { %v321_v7 = vadd.f32 %v320_v5, %v1065_v56  ;;  %v401_v8 = vadd.f32 %v400_v6, %v1065_v56 }
 0x130   : > { %473 = vst.msk [vmem:[%s1070_s20 + $0x18] sm:$0xff] %vm469_vm0, %v326_v3  ;;  %489 = vst.msk [vmem:[%s1070_s20 + $0x98] sm:$0xff] %vm469_vm0, %v406_v4 }
 0x131   : > { %472 = vst.msk [vmem:[%s1070_s20 + $0x10] sm:$0xff] %vm469_vm0, %v321_v7  ;;  %488 = vst.msk [vmem:[%s1070_s20 + $0x90] sm:$0xff] %vm469_vm0, %v401_v8  ;;  %v671_v9 = vpop.f32.mrb[4].mxu0  ;;  %v695_v10 = vpop.f32.mrb[4].mxu1 }
 0x132   : > { %v336_v11 = vadd.f32 %v671_v9, %v1065_v56  ;;  %v416_v12 = vadd.f32 %v695_v10, %v1065_v56  ;;  %v330_v13 = vpop.f32.mrb[5].mxu0  ;;  %v410_v14 = vpop.f32.mrb[5].mxu1 }
 0x133   : > { %v331_v15 = vadd.f32 %v330_v13, %v1065_v56  ;;  %v411_v16 = vadd.f32 %v410_v14, %v1065_v56 }
 0x134   : > { %475 = vst.msk [vmem:[%s1070_s20 + $0x28] sm:$0xff] %vm469_vm0, %v336_v11  ;;  %491 = vst.msk [vmem:[%s1070_s20 + $0xa8] sm:$0xff] %vm469_vm0, %v416_v12 }
 0x135   : > { %474 = vst.msk [vmem:[%s1070_s20 + $0x20] sm:$0xff] %vm469_vm0, %v331_v15  ;;  %490 = vst.msk [vmem:[%s1070_s20 + $0xa0] sm:$0xff] %vm469_vm0, %v411_v16  ;;  %v674_v17 = vpop.f32.mrb[6].mxu0  ;;  %v698_v18 = vpop.f32.mrb[6].mxu1 }
 0x136   : > { %v346_v19 = vadd.f32 %v674_v17, %v1065_v56  ;;  %v426_v20 = vadd.f32 %v698_v18, %v1065_v56  ;;  %v340_v21 = vpop.f32.mrb[7].mxu0  ;;  %v420_v22 = vpop.f32.mrb[7].mxu1 }
 0x137   : > { %v341_v23 = vadd.f32 %v340_v21, %v1065_v56  ;;  %v421_v24 = vadd.f32 %v420_v22, %v1065_v56 }
 0x138   : > { %477 = vst.msk [vmem:[%s1070_s20 + $0x38] sm:$0xff] %vm469_vm0, %v346_v19  ;;  %493 = vst.msk [vmem:[%s1070_s20 + $0xb8] sm:$0xff] %vm469_vm0, %v426_v20 }
 0x139   : > { %476 = vst.msk [vmem:[%s1070_s20 + $0x30] sm:$0xff] %vm469_vm0, %v341_v23  ;;  %492 = vst.msk [vmem:[%s1070_s20 + $0xb0] sm:$0xff] %vm469_vm0, %v421_v24  ;;  %v677_v25 = vpop.f32.mrb[8].mxu0  ;;  %v701_v26 = vpop.f32.mrb[8].mxu1 }
 0x13a   : > { %v356_v27 = vadd.f32 %v677_v25, %v1065_v56  ;;  %v436_v28 = vadd.f32 %v701_v26, %v1065_v56  ;;  %v350_v29 = vpop.f32.mrb[9].mxu0  ;;  %v430_v30 = vpop.f32.mrb[9].mxu1 }
 0x13b   : > { %v351_v31 = vadd.f32 %v350_v29, %v1065_v56  ;;  %v431_v32 = vadd.f32 %v430_v30, %v1065_v56 }
 0x13c   : > { %479 = vst.msk [vmem:[%s1070_s20 + $0x48] sm:$0xff] %vm469_vm0, %v356_v27  ;;  %495 = vst.msk [vmem:[%s1070_s20 + $0xc8] sm:$0xff] %vm469_vm0, %v436_v28 }
 0x13d   : > { %478 = vst.msk [vmem:[%s1070_s20 + $0x40] sm:$0xff] %vm469_vm0, %v351_v31  ;;  %494 = vst.msk [vmem:[%s1070_s20 + $0xc0] sm:$0xff] %vm469_vm0, %v431_v32  ;;  %v680_v33 = vpop.f32.mrb[10].mxu0  ;;  %v704_v34 = vpop.f32.mrb[10].mxu1 }
 0x13e   : > { %v366_v35 = vadd.f32 %v680_v33, %v1065_v56  ;;  %v446_v36 = vadd.f32 %v704_v34, %v1065_v56  ;;  %v360_v37 = vpop.f32.mrb[11].mxu0  ;;  %v440_v38 = vpop.f32.mrb[11].mxu1 }
 0x13f   : > { %v361_v39 = vadd.f32 %v360_v37, %v1065_v56  ;;  %v441_v40 = vadd.f32 %v440_v38, %v1065_v56 }
 0x140   : > { %481 = vst.msk [vmem:[%s1070_s20 + $0x58] sm:$0xff] %vm469_vm0, %v366_v35  ;;  %497 = vst.msk [vmem:[%s1070_s20 + $0xd8] sm:$0xff] %vm469_vm0, %v446_v36 }
 0x141   : > { %480 = vst.msk [vmem:[%s1070_s20 + $0x50] sm:$0xff] %vm469_vm0, %v361_v39  ;;  %496 = vst.msk [vmem:[%s1070_s20 + $0xd0] sm:$0xff] %vm469_vm0, %v441_v40  ;;  %v683_v41 = vpop.f32.mrb[12].mxu0  ;;  %v707_v42 = vpop.f32.mrb[12].mxu1 }
 0x142   : > { %v376_v43 = vadd.f32 %v683_v41, %v1065_v56  ;;  %v456_v44 = vadd.f32 %v707_v42, %v1065_v56  ;;  %v370_v45 = vpop.f32.mrb[13].mxu0  ;;  %v450_v46 = vpop.f32.mrb[13].mxu1 }
 0x143   : > { %v371_v47 = vadd.f32 %v370_v45, %v1065_v56  ;;  %v451_v48 = vadd.f32 %v450_v46, %v1065_v56 }
 0x144   : > { %483 = vst.msk [vmem:[%s1070_s20 + $0x68] sm:$0xff] %vm469_vm0, %v376_v43  ;;  %499 = vst.msk [vmem:[%s1070_s20 + $0xe8] sm:$0xff] %vm469_vm0, %v456_v44 }
 0x145   : > { %482 = vst.msk [vmem:[%s1070_s20 + $0x60] sm:$0xff] %vm469_vm0, %v371_v47  ;;  %498 = vst.msk [vmem:[%s1070_s20 + $0xe0] sm:$0xff] %vm469_vm0, %v451_v48  ;;  %v686_v49 = vpop.f32.mrb[14].mxu0  ;;  %v710_v50 = vpop.f32.mrb[14].mxu1 }
 0x146   : > { %v386_v51 = vadd.f32 %v686_v49, %v1065_v56  ;;  %v466_v52 = vadd.f32 %v710_v50, %v1065_v56  ;;  %v380_v53 = vpop.f32.mrb[15].mxu0  ;;  %v460_v54 = vpop.f32.mrb[15].mxu1 }
 0x147   : > { %v381_v55 = vadd.f32 %v380_v53, %v1065_v56  ;;  %v461_v57 = vadd.f32 %v460_v54, %v1065_v56 }
 0x148   : > { %485 = vst.msk [vmem:[%s1070_s20 + $0x78] sm:$0xff] %vm469_vm0, %v386_v51  ;;  %501 = vst.msk [vmem:[%s1070_s20 + $0xf8] sm:$0xff] %vm469_vm0, %v466_v52 }
 0x149   : > { %484 = vst.msk [vmem:[%s1070_s20 + $0x70] sm:$0xff] %vm469_vm0, %v381_v55  ;;  %500 = vst.msk [vmem:[%s1070_s20 + $0xf0] sm:$0xff] %vm469_vm0, %v461_v57 }
 0x14a PF: > { %p14_p8 = scmp.ge.s32.totalorder %s912_s18, 4   ;;  %s1188_s14 = smov %s856_s15 }
 0x14b   : > { %s1189_s15 = smov %s860_s16  ;;  %s1190_s16 = smov %s922_s21 }
 0x14c   : > { %s1191_s17 = smov %s912_s18  ;;  %16 = sbr.rel (!%p14_p8) target bundleno = 5 (0x5), region = 72 }
 0x153   :  { %524 = vsyncpa [#allocation4], 1 }
 0x154   :  { %526 = vsyncpa [#allocation4 + $0x1], 1 }

</bundles_post_ra>
